<compile_context>
chip_gen: v6e
topology: v6e:2x2x1
jax: 0.10.0
libtpu: 0.0.40
codegen_flags: <defaults>
</compile_context>

<pallas_src>
import jax
import jax.numpy as jnp
from jax.experimental import pallas as pl
from jax.experimental.pallas import tpu as pltpu


def _linear_kernel(slab_ref, v3_ref):
    """slab_ref: (8, 2) f32 packed operands.

        rows 0..3 : v2 = cat(x, x.T) flattened over batch   (4, 2)
        rows 4..5 : W^T (so v3 = v2 @ W^T + b uses it directly)
        row  6    : bias
        row  7    : zero padding (sublane alignment)

    Writes v3 = v2 @ W^T + b  (nn.Linear semantics) -> (4, 2), computed with
    VPU broadcast-multiply/add only (no MXU).
    """
    v2 = slab_ref[0:4, :]                 # (4, 2)
    wt = slab_ref[4:6, :]                 # (2, 2) == W^T
    b = slab_ref[6:7, :]                  # (1, 2)
    # v3[i, j] = v2[i, 0] * W^T[0, j] + v2[i, 1] * W^T[1, j] + b[j]
    v3 = v2[:, 0:1] * wt[0:1, :] + v2[:, 1:2] * wt[1:2, :] + b
    v3_ref[...] = v3


def model_forward(x1, weight, bias):
    x = x1[0].astype(jnp.float32)                       # (2, 2)
    w = weight.astype(jnp.float32)                      # (2, 2)
    b = bias.astype(jnp.float32).reshape(1, 2)          # (1, 2)

    # v2 = cat((x1, x1.permute(0,2,1)), dim=0) flattened over the batch axis.
    v2 = jnp.concatenate([x, x.T], axis=0)              # (4, 2)

    # Single packed input slab: collapses 3 input DMAs into 1.
    slab = jnp.concatenate(
        [v2, w.T, b, jnp.zeros((1, 2), jnp.float32)], axis=0
    )                                                   # (8, 2)

    v3_flat = pl.pallas_call(
        _linear_kernel,
        out_shape=jax.ShapeDtypeStruct((4, 2), jnp.float32),
        in_specs=[pl.BlockSpec(memory_space=pltpu.MemorySpace.VMEM)],
        out_specs=pl.BlockSpec(memory_space=pltpu.MemorySpace.VMEM),
    )(slab)                                             # (4, 2) == torch v3 flattened

    # TODO(synk): torch.cat((v2, v3, v4), dim=0) raises in PyTorch (rank mismatch),
    # and reshape(2,1,4) requires exactly 8 elements; the only self-consistent
    # interpretation builds v6 from the 8-element v4 = v3.view(-1).
    # y = v4.reshape(2,1,4).permute(0,2,1) == v3.reshape(2,4,1) (pure metadata).
    return v3_flat.reshape(2, 4, 1)


if __name__ == "__main__":
    key = jax.random.PRNGKey(0)
    kx, kw, kb = jax.random.split(key, 3)

    # x1 ~ randn(1, 2, 2)
    x1 = jax.random.normal(kx, (1, 2, 2), dtype=jnp.float32)

    # Deterministic Linear(2, 2) init, torch-style U(-1/sqrt(in), 1/sqrt(in))
    bound = 1.0 / jnp.sqrt(2.0)
    weight = jax.random.uniform(kw, (2, 2), jnp.float32, -bound, bound)
    bias = jax.random.uniform(kb, (2,), jnp.float32, -bound, bound)

    y = model_forward(x1, weight, bias)
    y = jax.block_until_ready(y)
    assert y.shape == (2, 4, 1) and y.dtype == jnp.float32

    # Cross-check against plain-XLA reference of the same interpretation.
    x = x1[0]
    v2_ref = jnp.concatenate([x, x.T], axis=0)
    v3_ref = v2_ref @ weight.T + bias
    y_ref = v3_ref.reshape(2, 4, 1)
    assert jnp.allclose(y, y_ref, atol=1e-6, rtol=1e-6)

    print("KERNEL_OK")
</pallas_src>

<mosaic_0001>
module attributes {stable_mosaic.version = 11 : i64} {
  func.func @_linear_kernel(%arg0: memref<8x2xf32, #tpu.memory_space<vmem>>, %arg1: memref<4x2xf32, #tpu.memory_space<vmem>>) attributes {dimension_semantics = [], scalar_prefetch = 0 : i64, scratch_operands = 0 : i64, tpu.core_type = #tpu.core_type<tc>} {
    %c0 = arith.constant 0 : index
    %c0_0 = arith.constant 0 : index
    %0 = vector.load %arg0[%c0, %c0_0] : memref<8x2xf32, #tpu.memory_space<vmem>>, vector<4x2xf32>
    %c4 = arith.constant 4 : index
    %c0_1 = arith.constant 0 : index
    %1 = vector.load %arg0[%c4, %c0_1] : memref<8x2xf32, #tpu.memory_space<vmem>>, vector<2x2xf32>
    %c6 = arith.constant 6 : index
    %c0_2 = arith.constant 0 : index
    %2 = vector.load %arg0[%c6, %c0_2] : memref<8x2xf32, #tpu.memory_space<vmem>>, vector<1x2xf32>
    %3 = vector.extract_strided_slice %0 {offsets = [0, 0], sizes = [4, 1], strides = [1, 1]} : vector<4x2xf32> to vector<4x1xf32>
    %4 = vector.extract_strided_slice %1 {offsets = [0, 0], sizes = [1, 2], strides = [1, 1]} : vector<2x2xf32> to vector<1x2xf32>
    %5 = vector.broadcast %3 : vector<4x1xf32> to vector<4x2xf32>
    %6 = vector.broadcast %4 : vector<1x2xf32> to vector<4x2xf32>
    %7 = arith.mulf %5, %6 : vector<4x2xf32>
    %8 = vector.extract_strided_slice %0 {offsets = [0, 1], sizes = [4, 1], strides = [1, 1]} : vector<4x2xf32> to vector<4x1xf32>
    %9 = vector.extract_strided_slice %1 {offsets = [1, 0], sizes = [1, 2], strides = [1, 1]} : vector<2x2xf32> to vector<1x2xf32>
    %10 = vector.broadcast %8 : vector<4x1xf32> to vector<4x2xf32>
    %11 = vector.broadcast %9 : vector<1x2xf32> to vector<4x2xf32>
    %12 = arith.mulf %10, %11 : vector<4x2xf32>
    %13 = arith.addf %7, %12 : vector<4x2xf32>
    %14 = vector.broadcast %2 : vector<1x2xf32> to vector<4x2xf32>
    %15 = arith.addf %13, %14 : vector<4x2xf32>
    %c0_3 = arith.constant 0 : index
    %c0_4 = arith.constant 0 : index
    %16 = vector.load %arg1[%c0_3, %c0_4] : memref<4x2xf32, #tpu.memory_space<vmem>>, vector<4x2xf32>
    tpu.vector_store %arg1[%c0_3, %c0_4], %15 {strides = array<i32>} : memref<4x2xf32, #tpu.memory_space<vmem>>, vector<4x2xf32>,
    return
  }
}

</mosaic_0001>

<bundles_post_ra>
// kernel: tpu_custom_call.1
= control target key start
LH: loop header
LB: loop body
LE: loop exit
PB: predicated region body
PF: predicated region fallthrough
CT: control target
= control target key end

     0   :  { %v47_v0 = vmov 0   ;;  %v48_v2 = vmov 1   ;;  %v16_v3 = vlaneseq  ;;  %vm36_vm0 = vcmask 11264   ;;  %s71_s0 = inlined_call_operand.vmem [shape: f32[8,2], index: 0, kind: input, shape index: {}]   ;;  %s72_s1 = inlined_call_operand.vmem [shape: f32[4,2], index: 1, kind: output, shape index: {}]  }
   0x1   :  { %45 = vset.pattern.permute.xlu0 %v47_v0  ;;  %v8_v1 = vld [vmem:[%s71_s0] sm:$0xf]  ;;  %v9_v7 = vld [vmem:[%s71_s0 + $0x4] sm:$0x3]  ;;  %v42_v14 = vld [vmem:[%s71_s0 + $0x6] ss:$0 sm:$0xff] }
   0x2   :  { %13 = vperm.xlu0 %45, %v8_v1   ;;  %v17_v4 = vshrl.u32 %v16_v3, 7 }
   0x4   :  { %v18_v5 = vsub.s32 0, %v17_v4  ;;  %v27_v6 = vsub.s32 1, %v17_v4 }
   0x6   :  { %46 = vset.pattern.permute.xlu0 %v48_v2  ;;  %v19_v9 = vrot.slane %v9_v7, %v18_v5  ;;  %v28_v10 = vrot.slane %v9_v7, %v27_v6 }
   0x7   :  { %22 = vperm.xlu0 %46, %v8_v1  }
  0x7d   :  { %v14_v8 = vpop.permute.xlu0 %13 }
  0x7e   :  { %v20_v12 = vmul.f32 %v19_v9, %v14_v8 }
  0x82   :  { %v23_v11 = vpop.permute.xlu0 %22 }
  0x83   :  { %v29_v13 = vmul.f32 %v28_v10, %v23_v11 }
  0x85   :  { %v30_v15 = vadd.f32 %v29_v13, %v20_v12 }
  0x87   :  { %v35_v16 = vadd.f32 %v42_v14, %v30_v15 }
  0x89   :  { %37 = vst.msk [vmem:[%s72_s1] sm:$0xf] %vm36_vm0, %v35_v16 }

</bundles_post_ra>
